<compile_context>
chip_gen: v7x
topology: tpu7x:2x2x1
jax: 0.10.0
libtpu: 0.0.40
codegen_flags: <defaults>
</compile_context>

<pallas_src>
import math

import jax
import jax.numpy as jnp
from jax.experimental import pallas as pl
from jax.experimental.pallas import tpu as pltpu


def _round_up(v, m):
    return ((v + m - 1) // m) * m


def _tile_config():
    """Per-generation max tile sizes and VMEM budget."""
    kind = ""
    try:
        kind = jax.devices()[0].device_kind.lower()
    except Exception:
        pass
    if "v6" in kind:
        # v6e: 918 TF/s vs ~1.4 TB/s -> need big tiles; 128 MiB physical VMEM.
        return dict(tm_max=1024, tn_max=2048, tk_max=512,
                    vmem_limit=96 * 1024 * 1024)
    if "7" in kind:
        # v7x: only 64 MiB VMEM per TensorCore -- keep tiles modest.
        return dict(tm_max=512, tn_max=1024, tk_max=1024,
                    vmem_limit=48 * 1024 * 1024)
    if "v5 lite" in kind or "v5e" in kind or "v5lite" in kind:
        return dict(tm_max=512, tn_max=1024, tk_max=512,
                    vmem_limit=64 * 1024 * 1024)
    # Unknown generation: conservative defaults.
    return dict(tm_max=512, tn_max=1024, tk_max=512,
                vmem_limit=48 * 1024 * 1024)


def linear_n_kernel(x_ref, w_ref, b_ref, aux_ref, o_ref):
    # x_ref:   (tm, tk) compute dtype (bf16/f32)
    # w_ref:   (tk, tn) compute dtype, [K, N] layout
    # b_ref:   (1, tn)  f32      aux_ref: (1, tn) f32
    # o_ref:   (tm, tn) f32 -- resident across the K grid axis (acts as the
    #          accumulator; no separate VMEM scratch needed).
    k = pl.program_id(2)
    partial = jnp.dot(x_ref[...], w_ref[...],
                      preferred_element_type=jnp.float32)

    @pl.when(k == 0)
    def _init():
        o_ref[...] = partial

    @pl.when(k > 0)
    def _accum():
        o_ref[...] += partial

    @pl.when(k == pl.num_programs(2) - 1)
    def _finalize():
        # f32 epilogue: bias add + neuron-prune mask (single vsel).
        # Note: jnp.where zeroes NaN/Inf in pruned columns (PyTorch's `* mask`
        # would propagate NaN) -- usually the desirable behavior.
        o_ref[...] = jnp.where(aux_ref[...] > 0.0,
                               o_ref[...] + b_ref[...], 0.0)


def prepare_params(weight, bias, weight_aux, *, param_dtype=jnp.bfloat16,
                   tn_max=None, tk_max=None):
    """One-time parameter preparation (hoisted out of the forward).

    weight: [size_out, size_in] (PyTorch layout), bias/weight_aux: [size_out].
    Transposes W to [K, N], pads K/N to tile multiples and casts to the MXU
    compute dtype so no per-call pass over W is needed.
    """
    N, K = weight.shape
    cfg = _tile_config()
    tn = min(tn_max or cfg["tn_max"], _round_up(N, 128))
    tk = min(tk_max or cfg["tk_max"], _round_up(K, 128))
    Np, Kp = _round_up(N, tn), _round_up(K, tk)

    w_t = jnp.pad(weight.T, ((0, Kp - K), (0, Np - N))).astype(param_dtype)
    b2 = jnp.pad(bias, (0, Np - N)).astype(jnp.float32).reshape(1, Np)
    a2 = jnp.pad(weight_aux, (0, Np - N)).astype(jnp.float32).reshape(1, Np)
    return dict(w=w_t, b=b2, aux=a2, N=N, K=K, Np=Np, Kp=Kp, tn=tn, tk=tk,
                param_dtype=param_dtype, tm_max=cfg["tm_max"],
                vmem_limit=cfg["vmem_limit"])


def linear_layer_n(x, params, *, tm_max=None):
    """x: [B, size_in] f32. Returns [B, size_out] f32."""
    B, K = x.shape
    assert K == params["K"], "size_in mismatch"
    Np, Kp, tn, tk = params["Np"], params["Kp"], params["tn"], params["tk"]
    cdtype = params["param_dtype"]

    # tm: multiple of 16 (bf16 sublane packing), clamped to the padded batch.
    tm = min(tm_max or params["tm_max"], _round_up(B, 16))
    Mp = _round_up(B, tm)

    # If the (i, j) grid would be a single block, split the widest axis so the
    # parallel axes can actually shard across two TensorCores (v7x megacore).
    if Mp // tm == 1 and Np // tn == 1:
        if tn % 256 == 0:
            tn //= 2
        elif tm % 32 == 0:
            tm //= 2
            Mp = _round_up(B, tm)

    xp = x
    if (Mp, Kp) != (B, K):
        xp = jnp.pad(xp, ((0, Mp - B), (0, Kp - K)))
    xp = xp.astype(cdtype)  # cast in the wrapper: DMA moves 2-byte operands

    grid = (Mp // tm, Np // tn, Kp // tk)

    out = pl.pallas_call(
        linear_n_kernel,
        out_shape=jax.ShapeDtypeStruct((Mp, Np), jnp.float32),
        grid_spec=pltpu.PrefetchScalarGridSpec(
            num_scalar_prefetch=0,
            grid=grid,
            in_specs=[
                pl.BlockSpec((tm, tk), lambda i, j, k: (i, k)),   # x tile
                pl.BlockSpec((tk, tn), lambda i, j, k: (k, j)),   # W tile [K,N]
                pl.BlockSpec((1, tn), lambda i, j, k: (0, j)),    # bias slice
                pl.BlockSpec((1, tn), lambda i, j, k: (0, j)),    # aux slice
            ],
            out_specs=pl.BlockSpec((tm, tn), lambda i, j, k: (i, j)),
        ),
        compiler_params=pltpu.CompilerParams(
            dimension_semantics=("parallel", "parallel", "arbitrary"),
            vmem_limit_bytes=params["vmem_limit"],
        ),
    )(xp, params["w"], params["b"], params["aux"])

    if (Mp, Np) != (B, params["N"]):
        out = out[:B, :params["N"]]
    return out


def init_params(key, size_in, size_out):
    """Deterministic init matching the shapes/bounds of the PyTorch module."""
    k_w, k_aux, k_b = jax.random.split(key, 3)
    # kaiming_uniform_(a=sqrt(5)) on a (size_out, size_in) weight.
    fan_in = size_in
    bound_w = math.sqrt(1.0 / 3.0) * math.sqrt(3.0 / fan_in)
    weight = jax.random.uniform(
        k_w, (size_out, size_in), jnp.float32, minval=-bound_w, maxval=bound_w)
    # uniform_(weight_aux) is U[0, 1); shift half negative so the pruning
    # mask is actually exercised.
    weight_aux = jax.random.uniform(k_aux, (size_out,), jnp.float32) - 0.5
    bound_b = 1.0 / math.sqrt(fan_in)
    bias = jax.random.uniform(
        k_b, (size_out,), jnp.float32, minval=-bound_b, maxval=bound_b)
    return weight, bias, weight_aux


if __name__ == "__main__":
    key = jax.random.PRNGKey(0)
    k_x, k_p, k_x2, k_p2 = jax.random.split(key, 4)

    # --- 1) small shape consistent with the module ---
    B, size_in, size_out = 8, 32, 64
    x = jax.random.normal(k_x, (B, size_in), jnp.float32)
    weight, bias, weight_aux = init_params(k_p, size_in, size_out)

    # Pure-JAX reference (matches the PyTorch forward).
    ref = (x @ weight.T + bias) * (weight_aux > 0).astype(jnp.float32)

    # Exact-parity path: f32 operands.
    p_f32 = prepare_params(weight, bias, weight_aux, param_dtype=jnp.float32)
    out_f32 = jax.block_until_ready(linear_layer_n(x, p_f32))
    assert out_f32.shape == (B, size_out)
    assert jnp.allclose(out_f32, ref, atol=1e-5, rtol=1e-5)

    # Performance path: bf16 operands, f32 accumulation in the output block.
    p_bf16 = prepare_params(weight, bias, weight_aux)  # default bf16
    out_bf16 = jax.block_until_ready(linear_layer_n(x, p_bf16))
    assert out_bf16.shape == (B, size_out)
    assert jnp.allclose(out_bf16, ref, atol=5e-2, rtol=5e-2)

    # --- 2) odd shape exercising multi-block grid (M, N, K) + padding ---
    B2, in2, out2 = 24, 320, 200
    x2 = jax.random.normal(k_x2, (B2, in2), jnp.float32)
    w2, b2, a2 = init_params(k_p2, in2, out2)
    ref2 = (x2 @ w2.T + b2) * (a2 > 0).astype(jnp.float32)
    p2 = prepare_params(w2, b2, a2, param_dtype=jnp.float32,
                        tn_max=128, tk_max=128)
    out2_k = jax.block_until_ready(linear_layer_n(x2, p2, tm_max=16))
    assert out2_k.shape == (B2, out2)
    assert jnp.allclose(out2_k, ref2, atol=1e-4, rtol=1e-4)

    print("KERNEL_OK")
</pallas_src>

<mosaic_0001>
module attributes {stable_mosaic.version = 11 : i64} {
  func.func @linear_n_kernel(%arg0: i32, %arg1: i32, %arg2: i32, %arg3: memref<16x128xf32, #tpu.memory_space<vmem>>, %arg4: memref<128x128xf32, #tpu.memory_space<vmem>>, %arg5: memref<1x128xf32, #tpu.memory_space<vmem>>, %arg6: memref<1x128xf32, #tpu.memory_space<vmem>>, %arg7: memref<16x128xf32, #tpu.memory_space<vmem>>) attributes {dimension_semantics = [#tpu.dimension_semantics<parallel>, #tpu.dimension_semantics<parallel>, #tpu.dimension_semantics<arbitrary>], iteration_bounds = array<i64: 1, 1, 1>, scalar_prefetch = 0 : i64, scratch_operands = 0 : i64, tpu.core_type = #tpu.core_type<tc>, window_params = [{transform_indices = @transform_0, window_bounds = array<i64: 16, 128>}, {transform_indices = @transform_1, window_bounds = array<i64: 128, 128>}, {transform_indices = @transform_2, window_bounds = array<i64: 1, 128>}, {transform_indices = @transform_3, window_bounds = array<i64: 1, 128>}, {transform_indices = @transform_4, window_bounds = array<i64: 16, 128>}]} {
    %c0 = arith.constant 0 : index
    %c0_0 = arith.constant 0 : index
    %0 = vector.load %arg3[%c0, %c0_0] : memref<16x128xf32, #tpu.memory_space<vmem>>, vector<16x128xf32>
    %c0_1 = arith.constant 0 : index
    %c0_2 = arith.constant 0 : index
    %1 = vector.load %arg4[%c0_1, %c0_2] : memref<128x128xf32, #tpu.memory_space<vmem>>, vector<128x128xf32>
    %cst = arith.constant dense<0.000000e+00> : vector<16x128xf32>
    %2 = tpu.matmul %0, %1, %cst {dimension_numbers = #tpu.dot_dimension_numbers<[1], [0], [0], [1], [0, 0, 1, 1], [], []>} : vector<16x128xf32>, vector<128x128xf32>, vector<16x128xf32> -> vector<16x128xf32>
    %c0_i32 = arith.constant 0 : i32
    %3 = arith.cmpi eq, %arg2, %c0_i32 : i32
    %4 = arith.extui %3 : i1 to i32
    %c0_i32_3 = arith.constant 0 : i32
    %5 = arith.cmpi ne, %4, %c0_i32_3 : i32
    scf.if %5 {
      %c0_8 = arith.constant 0 : index
      %c0_9 = arith.constant 0 : index
      %12 = vector.load %arg7[%c0_8, %c0_9] : memref<16x128xf32, #tpu.memory_space<vmem>>, vector<16x128xf32>
      tpu.vector_store %arg7[%c0_8, %c0_9], %2 {strides = array<i32>} : memref<16x128xf32, #tpu.memory_space<vmem>>, vector<16x128xf32>,
    } else {
    }
    %c0_i32_4 = arith.constant 0 : i32
    %6 = arith.cmpi sgt, %arg2, %c0_i32_4 : i32
    %7 = arith.extui %6 : i1 to i32
    %c0_i32_5 = arith.constant 0 : i32
    %8 = arith.cmpi ne, %7, %c0_i32_5 : i32
    scf.if %8 {
      %c0_8 = arith.constant 0 : index
      %c0_9 = arith.constant 0 : index
      %12 = vector.load %arg7[%c0_8, %c0_9] : memref<16x128xf32, #tpu.memory_space<vmem>>, vector<16x128xf32>
      %13 = arith.addf %12, %2 : vector<16x128xf32>
      %c0_10 = arith.constant 0 : index
      %c0_11 = arith.constant 0 : index
      %14 = vector.load %arg7[%c0_10, %c0_11] : memref<16x128xf32, #tpu.memory_space<vmem>>, vector<16x128xf32>
      tpu.vector_store %arg7[%c0_10, %c0_11], %13 {strides = array<i32>} : memref<16x128xf32, #tpu.memory_space<vmem>>, vector<16x128xf32>,
    } else {
    }
    %c0_i32_6 = arith.constant 0 : i32
    %9 = arith.cmpi eq, %arg2, %c0_i32_6 : i32
    %10 = arith.extui %9 : i1 to i32
    %c0_i32_7 = arith.constant 0 : i32
    %11 = arith.cmpi ne, %10, %c0_i32_7 : i32
    scf.if %11 {
      %c0_8 = arith.constant 0 : index
      %c0_9 = arith.constant 0 : index
      %12 = vector.load %arg6[%c0_8, %c0_9] : memref<1x128xf32, #tpu.memory_space<vmem>>, vector<1x128xf32>
      %cst_10 = arith.constant 0.000000e+00 : f32
      %13 = vector.broadcast %cst_10 : f32 to vector<1x128xf32>
      %14 = arith.cmpf ogt, %12, %13 : vector<1x128xf32>
      %c0_11 = arith.constant 0 : index
      %c0_12 = arith.constant 0 : index
      %15 = vector.load %arg7[%c0_11, %c0_12] : memref<16x128xf32, #tpu.memory_space<vmem>>, vector<16x128xf32>
      %c0_13 = arith.constant 0 : index
      %c0_14 = arith.constant 0 : index
      %16 = vector.load %arg5[%c0_13, %c0_14] : memref<1x128xf32, #tpu.memory_space<vmem>>, vector<1x128xf32>
      %17 = vector.broadcast %16 : vector<1x128xf32> to vector<16x128xf32>
      %18 = arith.addf %15, %17 : vector<16x128xf32>
      %cst_15 = arith.constant 0.000000e+00 : f32
      %19 = vector.shape_cast %14 : vector<1x128xi1> to vector<1x128xi1>
      %20 = vector.broadcast %19 : vector<1x128xi1> to vector<16x128xi1>
      %21 = vector.broadcast %cst_15 : f32 to vector<16x128xf32>
      %22 = arith.select %20, %18, %21 : vector<16x128xi1>, vector<16x128xf32>
      %c0_16 = arith.constant 0 : index
      %c0_17 = arith.constant 0 : index
      %23 = vector.load %arg7[%c0_16, %c0_17] : memref<16x128xf32, #tpu.memory_space<vmem>>, vector<16x128xf32>
      tpu.vector_store %arg7[%c0_16, %c0_17], %22 {strides = array<i32>} : memref<16x128xf32, #tpu.memory_space<vmem>>, vector<16x128xf32>,
    } else {
    }
    return
  }
  func.func @transform_0(%arg0: i32, %arg1: i32, %arg2: i32) -> (i32, i32) {
    %c0_i32 = arith.constant 0 : i32
    return %arg0, %arg2 : i32, i32
  }
  func.func @transform_1(%arg0: i32, %arg1: i32, %arg2: i32) -> (i32, i32) {
    %c0_i32 = arith.constant 0 : i32
    return %arg2, %arg1 : i32, i32
  }
  func.func @transform_2(%arg0: i32, %arg1: i32, %arg2: i32) -> (i32, i32) {
    %c0_i32 = arith.constant 0 : i32
    %c0_i32_0 = arith.constant 0 : i32
    return %c0_i32, %arg1 : i32, i32
  }
  func.func @transform_3(%arg0: i32, %arg1: i32, %arg2: i32) -> (i32, i32) {
    %c0_i32 = arith.constant 0 : i32
    %c0_i32_0 = arith.constant 0 : i32
    return %c0_i32, %arg1 : i32, i32
  }
  func.func @transform_4(%arg0: i32, %arg1: i32, %arg2: i32) -> (i32, i32) {
    %c0_i32 = arith.constant 0 : i32
    return %arg0, %arg1 : i32, i32
  }
}

</mosaic_0001>

<bundles_post_ra>
// kernel: tpu_custom_call.1
= control target key start
LH: loop header
LB: loop body
LE: loop exit
PB: predicated region body
PF: predicated region fallthrough
CT: control target
= control target key end

     0   :  { %9 = vsyncpa [#allocation3], 0  ;;  %s445_s0 = inlined_call_operand.hbm [shape: f32[16,128], index: 0, kind: input, shape index: {}]   ;;  %s446_s1 = inlined_call_operand.hbm [shape: f32[128,128], index: 1, kind: input, shape index: {}]   ;;  %s447_s2 = inlined_call_operand.vmem [shape: f32[1,128], index: 2, kind: input, shape index: {}]   ;;  %s448_s3 = inlined_call_operand.vmem [shape: f32[1,128], index: 3, kind: input, shape index: {}]   ;;  %s449_s4 = inlined_call_operand.hbm [shape: f32[16,128], index: 4, kind: output, shape index: {}]  }
   0x1   :  { %10 = vsyncpa [#allocation6], 0 }
   0x2   :  { %11 = vsyncpa [#allocation4], 0  ;;  %s363_s15 = smov [#allocation2]   ;;  %s291_s19 = scalar_lea.hbm %s445_s0, 256 }
   0x3   :  { %s17_s16 = sshll.u32 %s363_s15, 4  ;;  %p292_p0 = scmp.ne.s32.totalorder %s445_s0, %s291_s19  ;;  %s18_s16 = int_to_ptr.vmem [resolvable:$true] %s17_s16 }
   0x4   :  { %p295_p1 = scmp.lt.u32.totalorder %s291_s19, %s445_s0 }
   0x6   :  { %p297_p2 = pnand %p295_p1, %p292_p0 }
   0x8   :  { %300 = shalt.err (!%p297_p2)
}
   0x9   :  { %s301_s24 = scalar_lea.vmem %s18_s16, 256  ;;  %p306_p4 = scmp.lt.s32.totalorder %s18_s16, %s18_s16 }
   0xa   :  { %p302_p3 = scmp.ne.s32.totalorder %s18_s16, %s301_s24  ;;  %p307_p5 = scmp.lt.s32.totalorder %s301_s24, %s301_s24 }
   0xc   :  { %p308_p6 = por %p307_p5, %p306_p4 }
   0xe   :  { %p309_p7 = pnand %p308_p6, %p302_p3 }
  0x10   :  { %312 = shalt.err (!%p309_p7)
}
  0x11   :  { %s364_s25 = smov 128   ;;  %s365_s26 = smov 8  }
  0x12   :  { %23 = dma.hbm_to_vmem [thread:$0]  %s445_s0, 256, %s18_s16, [#allocation3], %s364_s25, %s364_s25, %s365_s26  }
  0x13   :  { %s366_s29 = smov [#allocation5]   ;;  %s313_s7 = scalar_lea.hbm %s446_s1, 2048 }
  0x14   :  { %s29_s30 = sshll.u32 %s366_s29, 4  ;;  %p314_p8 = scmp.ne.s32.totalorder %s446_s1, %s313_s7  ;;  %s30_s30 = int_to_ptr.vmem [resolvable:$true] %s29_s30 }
  0x15   :  { %p317_p9 = scmp.lt.u32.totalorder %s313_s7, %s446_s1 }
  0x17   :  { %p319_p10 = pnand %p317_p9, %p314_p8 }
  0x19   :  { %322 = shalt.err (!%p319_p10)
}
  0x1a   :  { %s323_s12 = scalar_lea.vmem %s30_s30, 2048  ;;  %p328_p12 = scmp.lt.s32.totalorder %s30_s30, %s30_s30 }
  0x1b   :  { %p324_p11 = scmp.ne.s32.totalorder %s30_s30, %s323_s12  ;;  %p329_p13 = scmp.lt.s32.totalorder %s323_s12, %s323_s12 }
  0x1d   :  { %p330_p0 = por %p329_p13, %p328_p12 }
  0x1f   :  { %p331_p1 = pnand %p330_p0, %p324_p11 }
  0x21   :  { %334 = shalt.err (!%p331_p1)
}
  0x22   :  { %35 = dma.hbm_to_vmem [thread:$0]  %s446_s1, 2048, %s30_s30, [#allocation6], %s364_s25, %s364_s25, %s365_s26  }
  0x23   :  { %357 = dma.done.wait [#allocation3], 256  }
  0x24   :  { %358 = vsyncadd [#allocation3], 4294967040 }
  0x25   :  { %359 = dma.done.wait [#allocation6], 2048  }
  0x26   :  { %360 = vsyncadd [#allocation6], 4294965248  ;;  %v48_v0 = vld [vmem:[#allocation5] sm:$0xff]  ;;  %v49_v1 = vld [vmem:[#allocation5 + $0x8] sm:$0xff]  ;;  %v172_v26 = vlaneseq  ;;  %v367_v30 = vmov 0   ;;  %s368_s17 = smov [#allocation7]  }
  0x27   :  { %v50_v2 = vld [vmem:[#allocation5 + $0x10] sm:$0xff]  ;;  %v253_v3 = vpack.c.bf16 %v49_v1, %v48_v0  ;;  %v51_v4 = vld [vmem:[#allocation5 + $0x18] sm:$0xff]  ;;  %v52_v6 = vld [vmem:[#allocation5 + $0x20] sm:$0xff]  ;;  %s186_s18 = sshll.u32 %s368_s17, 4  ;;  %s187_s18 = int_to_ptr.vmem [resolvable:$true] %s186_s18 }
  0x28   :  { %v257_v5 = vpack.c.bf16 %v51_v4, %v50_v2  ;;  %v53_v7 = vld [vmem:[#allocation5 + $0x28] sm:$0xff]  ;;  %v46_v9 = vld [vmem:[#allocation2] sm:$0xff]  ;;  %v55_v11 = vld [vmem:[#allocation5 + $0x38] sm:$0xff]  ;;  %v173_v28 = vshrl.u32 %v172_v26, 7  ;;  %p340_p3 = scmp.lt.s32.totalorder %s187_s18, %s187_s18 }
  0x29   :  { %254 = vmatprep.subr.bf16.mxu0 %v253_v3  ;;  %v261_v8 = vpack.c.bf16 %v53_v7, %v52_v6  ;;  %v54_v10 = vld [vmem:[#allocation5 + $0x30] sm:$0xff]  ;;  %250 = vmatprep.mubr.f32.mxu0 %v46_v9  ;;  %v56_v13 = vld [vmem:[#allocation5 + $0x40] sm:$0xff]  ;;  %v57_v14 = vld [vmem:[#allocation5 + $0x48] sm:$0xff] }
  0x2a   :  { %256 = vmatpush3.bf16.msra.mxu0 %v253_v3  ;;  %v265_v12 = vpack.c.bf16 %v55_v11, %v54_v10  ;;  %v269_v15 = vpack.c.bf16 %v57_v14, %v56_v13  ;;  %v58_v16 = vld [vmem:[#allocation5 + $0x50] sm:$0xff]  ;;  %v59_v17 = vld [vmem:[#allocation5 + $0x58] sm:$0xff]  ;;  %v60_v19 = vld [vmem:[#allocation5 + $0x60] sm:$0xff]  ;;  %v174_v29 = vsub.s32 0, %v173_v28 }
  0x2b   :  { %258 = vmatprep.subr.bf16.mxu0 %v257_v5  ;;  %v273_v18 = vpack.c.bf16 %v59_v17, %v58_v16  ;;  %v61_v20 = vld [vmem:[#allocation5 + $0x68] sm:$0xff]  ;;  %v62_v22 = vld [vmem:[#allocation5 + $0x70] sm:$0xff]  ;;  %v63_v23 = vld [vmem:[#allocation5 + $0x78] sm:$0xff] }
  0x2c   :  { %v277_v21 = vpack.c.bf16 %v61_v20, %v60_v19  ;;  %v281_v24 = vpack.c.bf16 %v63_v23, %v62_v22  ;;  %v47_v25 = vld [vmem:[#allocation2 + $0x8] sm:$0xff]  ;;  %v158_v27 = vld [vmem:[%s448_s3] sm:$0x1]  ;;  %s335_s3 = scalar_lea.vmem %s187_s18, 256 }
  0x2d   :  { %vm159_vm0 = vcmp.gt.f32.partialorder %v158_v27, 0.0  ;;  %v199_v33 = vld [vmem:[%s447_s2] ss:$0 sm:$0xff]  ;;  %p336_p2 = scmp.ne.s32.totalorder %s187_s18, %s335_s3  ;;  %p341_p4 = scmp.lt.s32.totalorder %s335_s3, %s335_s3 }
  0x2e   :  { %260 = vmatpush3.bf16.msra.mxu0 %v257_v5  ;;  %v171_v31 = vsel %vm159_vm0, 1, %v367_v30 }
  0x2f   :  { %262 = vmatprep.subr.bf16.mxu0 %v261_v8  ;;  %v175_v32 = vrot.slane %v171_v31, %v174_v29  ;;  %p342_p5 = por %p341_p4, %p340_p3 }
  0x31   :  { %vm176_vm1 = vcmp.eq.s32.totalorder %v175_v32, 1  ;;  %p343_p6 = pnand %p342_p5, %p336_p2 }
  0x32   :  { %264 = vmatpush3.bf16.msra.mxu0 %v261_v8 }
  0x33   :  { %266 = vmatprep.subr.bf16.mxu0 %v265_v12 }
  0x36   :  { %268 = vmatpush3.bf16.msra.mxu0 %v265_v12 }
  0x37   :  { %270 = vmatprep.subr.bf16.mxu0 %v269_v15 }
  0x3a   :  { %272 = vmatpush3.bf16.msra.mxu0 %v269_v15 }
  0x3b   :  { %274 = vmatprep.subr.bf16.mxu0 %v273_v18 }
  0x3e   :  { %276 = vmatpush3.bf16.msra.mxu0 %v273_v18 }
  0x3f   :  { %278 = vmatprep.subr.bf16.mxu0 %v277_v21 }
  0x42   :  { %280 = vmatpush3.bf16.msra.mxu0 %v277_v21 }
  0x43   :  { %282 = vmatprep.subr.bf16.mxu0 %v281_v24 }
  0x46   :  { %284 = vmatpush3.bf16.msra.mxu0 %v281_v24 }
  0x49   :  { %251 = vmatmul.mubr.f32.vlgmr.msra.gmra.mrb[0].mxu0 %v47_v25 }
 0x11c   :  { %v252_v34 = vpop.f32.mrb[0].mxu0 }
 0x11d   :  { %v130_v35 = vpop.f32.mrb[1].mxu0  ;;  %v170_v36 = vadd.f32 %v252_v34, %v199_v33 }
 0x11e   :  { %v169_v37 = vadd.f32 %v199_v33, %v130_v35 }
 0x11f   :  { %v178_v38 = vsel %vm176_vm1, %v170_v36, 0.0 }
 0x120   :  { %v177_v39 = vsel %vm176_vm1, %v169_v37, 0.0  ;;  %180 = vst [vmem:[#allocation7 + $0x8] sm:$0xff] %v178_v38 }
 0x121   :  { %179 = vst [vmem:[#allocation7] sm:$0xff] %v177_v39 }
 0x122   :  { %346 = shalt.err (!%p343_p6)
}
 0x123   :  { %s347_s20 = scalar_lea.hbm %s449_s4, 256 }
 0x124   :  { %p348_p7 = scmp.ne.s32.totalorder %s449_s4, %s347_s20  ;;  %p351_p8 = scmp.lt.u32.totalorder %s347_s20, %s449_s4 }
 0x126   :  { %p353_p9 = pnand %p351_p8, %p348_p7 }
 0x128   :  { %356 = shalt.err (!%p353_p9)
}
 0x129   :  { %192 = dma.vmem_to_hbm [thread:$0]  %s187_s18, 256, %s449_s4, [#allocation4], %s364_s25, %s364_s25, %s365_s26  }
 0x12a   :  { %361 = dma.done.wait [#allocation4], 256  }
 0x12b   :  { %362 = vsyncadd [#allocation4], 4294967040 }
 0x12c   :  { %196 = vsyncpa [#allocation3], 1 }
 0x12d   :  { %197 = vsyncpa [#allocation6], 1 }
 0x12e   :  { %198 = vsyncpa [#allocation4], 1 }

</bundles_post_ra>
